<compile_context>
chip_gen: v7x
topology: tpu7x:2x2x1
jax: 0.10.0
libtpu: 0.0.40
codegen_flags: <defaults>
</compile_context>

<pallas_src>
import functools

import jax
import jax.numpy as jnp
from jax.experimental import pallas as pl
from jax.experimental.pallas import tpu as pltpu


TILE_N_MAX = 256   # node-row tile (parallel grid axis)
TILE_E_MAX = 512   # edge tile (reduction grid axis); halve for v7x if F2 large


def _round_up(x, m):
    return ((x + m - 1) // m) * m


# --------------------------- Pallas kernels ---------------------------------

def _matmul_kernel(a_ref, b_ref, o_ref):
    o_ref[...] = jnp.dot(a_ref[...], b_ref[...],
                         preferred_element_type=jnp.float32)


def matmul_rows(a, b, tile_m=TILE_N_MAX):
    """Row-tiled (parallel) matmul; K/N kept whole (small for KBGAT relations)."""
    m, k = a.shape
    _, n = b.shape
    tm = tile_m if m >= tile_m else _round_up(m, 8)
    m_pad = _round_up(m, tm)
    a_p = jnp.pad(a, ((0, m_pad - m), (0, 0))) if m_pad != m else a
    out = pl.pallas_call(
        _matmul_kernel,
        out_shape=jax.ShapeDtypeStruct((m_pad, n), jnp.float32),
        grid=(m_pad // tm,),
        in_specs=[pl.BlockSpec((tm, k), lambda i: (i, 0)),
                  pl.BlockSpec((k, n), lambda i: (0, 0))],
        out_specs=pl.BlockSpec((tm, n), lambda i: (i, 0)),
        compiler_params=pltpu.CompilerParams(dimension_semantics=("parallel",)),
    )(a_p, b)
    # TODO(synk): add K/N tiling + f32 accumulator for very large relation sets.
    return out[:m]


def _l2norm_kernel(x_ref, o_ref):
    x = x_ref[...]
    ss = jnp.sum(x * x, axis=1, keepdims=True)
    # F.normalize(p=2, dim=1): x / max(||x||, 1e-12) == x * rsqrt(max(ss, 1e-24))
    o_ref[...] = x * jax.lax.rsqrt(jnp.maximum(ss, 1e-24))


def l2_normalize(x, tile_n):
    n_pad, d = x.shape
    return pl.pallas_call(
        _l2norm_kernel,
        out_shape=jax.ShapeDtypeStruct((n_pad, d), jnp.float32),
        grid=(n_pad // tile_n,),
        in_specs=[pl.BlockSpec((tile_n, d), lambda i: (i, 0))],
        out_specs=pl.BlockSpec((tile_n, d), lambda i: (i, 0)),
        compiler_params=pltpu.CompilerParams(dimension_semantics=("parallel",)),
    )(x)


def _gat_heads_kernel(a_t_ref, c_t_ref, expand_ref, edge_h_ref, dst_ref,
                      o_ref, acc_num_ref, acc_den_ref, *, alpha, apply_elu):
    """All-heads sparse GAT layer, tiled (node tiles x edge tiles)."""
    i = pl.program_id(0)                      # node-row tile   (parallel)
    j = pl.program_id(1)                      # edge tile       (arbitrary/reduction)
    tile_n = acc_num_ref.shape[0]
    tile_e = edge_h_ref.shape[0]

    @pl.when(j == 0)
    def _():
        acc_num_ref[...] = jnp.zeros_like(acc_num_ref)
        acc_den_ref[...] = jnp.zeros_like(acc_den_ref)

    edge_h = edge_h_ref[...]                                          # (TE, F2)
    # per-edge head features (all heads stacked on lanes)
    edge_m = jnp.dot(edge_h, a_t_ref[...],
                     preferred_element_type=jnp.float32)              # (TE, H*D)
    # per-edge per-head logits (a2 @ a pre-folded into c_t in the wrapper)
    logits = jnp.dot(edge_h, c_t_ref[...],
                     preferred_element_type=jnp.float32)              # (TE, H)
    powers = -jnp.where(logits > 0, logits, alpha * logits)           # -leakyrelu
    edge_e = jnp.exp(powers)                                          # (TE, H)
    # lane-broadcast edge_e to each head's D columns via tiny one-hot matmul
    edge_e_full = jnp.dot(edge_e, expand_ref[...],
                          preferred_element_type=jnp.float32)         # (TE, H*D)
    edge_w = edge_e_full * edge_m                                     # (TE, H*D)

    # one-hot scatter for THIS (node-tile, edge-tile) only
    row_ids = i * tile_n + jax.lax.broadcasted_iota(
        jnp.int32, (tile_n, tile_e), 0)
    onehot = (row_ids == dst_ref[...]).astype(jnp.float32)            # (TN, TE)

    # numerator and softmax denominator both via MXU scatter-matmul
    acc_num_ref[...] += jnp.dot(onehot, edge_w,
                                preferred_element_type=jnp.float32)   # (TN, H*D)
    acc_den_ref[...] += jnp.dot(onehot, edge_e,
                                preferred_element_type=jnp.float32)   # (TN, H)

    @pl.when(j == pl.num_programs(1) - 1)
    def _():
        den = acc_den_ref[...]
        den = jnp.where(den == 0.0, 1e-12, den)                       # e_rowsum fix-up
        den_full = jnp.dot(den, expand_ref[...],
                           preferred_element_type=jnp.float32)        # (TN, H*D)
        h_out = acc_num_ref[...] / den_full
        if apply_elu:  # F.elu (alpha=1.0)
            h_out = jnp.where(h_out > 0, h_out, jnp.exp(h_out) - 1.0)
        o_ref[...] = h_out


def gat_heads(a_t, c_t, expand, edge_h, dst, n_pad, alpha, apply_elu,
              tile_n, tile_e):
    f2, hd = a_t.shape
    n_heads = c_t.shape[1]
    e_pad = edge_h.shape[0]
    grid = (n_pad // tile_n, e_pad // tile_e)
    kern = functools.partial(_gat_heads_kernel, alpha=alpha, apply_elu=apply_elu)
    return pl.pallas_call(
        kern,
        out_shape=jax.ShapeDtypeStruct((n_pad, hd), jnp.float32),
        grid=grid,
        in_specs=[
            pl.BlockSpec((f2, hd), lambda i, j: (0, 0)),        # a_t (stacked heads)
            pl.BlockSpec((f2, n_heads), lambda i, j: (0, 0)),   # c_t (a2@a stacked)
            pl.BlockSpec((n_heads, hd), lambda i, j: (0, 0)),   # head->cols one-hot
            pl.BlockSpec((tile_e, f2), lambda i, j: (j, 0)),    # edge features
            pl.BlockSpec((1, tile_e), lambda i, j: (0, j)),     # edge destinations
        ],
        out_specs=pl.BlockSpec((tile_n, hd), lambda i, j: (i, 0)),
        scratch_shapes=[pltpu.VMEM((tile_n, hd), jnp.float32),
                        pltpu.VMEM((tile_n, n_heads), jnp.float32)],
        compiler_params=pltpu.CompilerParams(
            dimension_semantics=("parallel", "arbitrary")),
    )(a_t, c_t, expand, edge_h, dst)


def _residual_norm_kernel(ent_ref, w_ref, mask_ref, oe_ref, o_ref):
    # out = normalize( ent @ W_entities + mask * out_entity , p=2, dim=1 )
    t = jnp.dot(ent_ref[...], w_ref[...],
                preferred_element_type=jnp.float32) + mask_ref[...] * oe_ref[...]
    ss = jnp.sum(t * t, axis=1, keepdims=True)
    o_ref[...] = t * jax.lax.rsqrt(jnp.maximum(ss, 1e-24))


def residual_combine_normalize(ent, w, mask_col, out_entity, tile_n):
    n_pad, k = ent.shape
    hid = w.shape[1]
    return pl.pallas_call(
        _residual_norm_kernel,
        out_shape=jax.ShapeDtypeStruct((n_pad, hid), jnp.float32),
        grid=(n_pad // tile_n,),
        in_specs=[pl.BlockSpec((tile_n, k), lambda i: (i, 0)),
                  pl.BlockSpec((k, hid), lambda i: (0, 0)),
                  pl.BlockSpec((tile_n, 1), lambda i: (i, 0)),
                  pl.BlockSpec((tile_n, hid), lambda i: (i, 0))],
        out_specs=pl.BlockSpec((tile_n, hid), lambda i: (i, 0)),
        compiler_params=pltpu.CompilerParams(dimension_semantics=("parallel",)),
    )(ent, w, mask_col, out_entity)


# --------------------------- model (glue + kernel calls) --------------------

def sp_graph_attention_forward(head_list, x, edge, edge_embed,
                               edge_list_nhop, edge_embed_nhop, alpha,
                               apply_elu, tile_n):
    """All SpGraphAttentionLayer heads of one stage in a single kernel launch."""
    n_heads = len(head_list)
    d_head = head_list[0]["a"].shape[0]
    hd = n_heads * d_head

    # stack per-head parameters; pre-fold the logit projection c_h = a2_h @ a_h
    a_t = jnp.concatenate([h["a"] for h in head_list], axis=0).T          # (F2, H*D)
    c_t = jnp.concatenate([h["a_2"] @ h["a"] for h in head_list], axis=0).T  # (F2, H)
    expand = (jnp.arange(n_heads)[:, None]
              == (jnp.arange(hd)[None, :] // d_head)).astype(jnp.float32)    # (H, H*D)

    # per-edge features, EDGE-MAJOR (no transpose)
    edge_all = jnp.concatenate([edge, edge_list_nhop], axis=1)            # (2, E)
    edge_embed_all = jnp.concatenate([edge_embed, edge_embed_nhop], 0)    # (E, rel)
    src0 = jnp.take(x, edge_all[0], axis=0)                               # (E, in)
    src1 = jnp.take(x, edge_all[1], axis=0)                               # (E, in)
    edge_h = jnp.concatenate([src0, src1, edge_embed_all], axis=1)        # (E, F2)
    dst = edge_all[0].astype(jnp.int32)                                   # (E,)
    # TODO(synk): fuse these gathers into the kernel via PrefetchScalarGridSpec
    #             + pl.Element row indexing instead of plain-JAX jnp.take.

    e = edge_h.shape[0]
    tile_e = min(TILE_E_MAX, _round_up(e, 128))
    e_pad = _round_up(e, tile_e)
    edge_h = jnp.pad(edge_h, ((0, e_pad - e), (0, 0)))                    # zero pad
    dst = jnp.pad(dst, (0, e_pad - e), constant_values=-1)[None, :]       # (1, E_pad)

    return gat_heads(a_t, c_t, expand, edge_h, dst, x.shape[0], alpha,
                     apply_elu, tile_n, tile_e)


def spgat_forward(params, x, relation_embed, edge_list, edge_type, edge_embed,
                  edge_list_nhop, edge_type_nhop, alpha, tile_n):
    """SpGAT.forward (heads batched into one kernel; concat is implicit)."""
    edge_embed_nhop = (jnp.take(relation_embed, edge_type_nhop[:, 0], axis=0)
                       + jnp.take(relation_embed, edge_type_nhop[:, 1], axis=0))
    x_cat = sp_graph_attention_forward(
        params["attentions"], x, edge_list, edge_embed,
        edge_list_nhop, edge_embed_nhop, alpha, apply_elu=True, tile_n=tile_n)
    # dropout_layer: p = drop_GAT = 0.0 -> identity

    out_relation_1 = matmul_rows(relation_embed, params["W"])
    edge_embed2 = jnp.take(out_relation_1, edge_type, axis=0)
    edge_embed_nhop2 = (jnp.take(out_relation_1, edge_type_nhop[:, 0], axis=0)
                        + jnp.take(out_relation_1, edge_type_nhop[:, 1], axis=0))
    # out_att has concat=False (no internal elu); SpGAT applies F.elu outside,
    # which is mathematically identical to apply_elu=True here.
    x_out = sp_graph_attention_forward(
        [params["out_att"]], x_cat, edge_list, edge_embed2,
        edge_list_nhop, edge_embed_nhop2, alpha, apply_elu=True, tile_n=tile_n)
    return x_out, out_relation_1


def spkbgat_forward(params, adj, batch_inputs, train_indices_nhop, alpha):
    """SpKBGATModified.forward (shuffle == 'normal' branch)."""
    edge_list, edge_type = adj
    num_nodes = params["entity_embeddings"].shape[0]
    tile_n = TILE_N_MAX if num_nodes >= TILE_N_MAX else _round_up(num_nodes, 8)
    n_pad = _round_up(num_nodes, tile_n)

    edge_list_nhop = jnp.stack(
        [train_indices_nhop[:, 3], train_indices_nhop[:, 0]], axis=0)    # (2, E2)
    edge_type_nhop = jnp.stack(
        [train_indices_nhop[:, 1], train_indices_nhop[:, 2]], axis=1)    # (E2, 2)

    edge_embed = jnp.take(params["relation_embeddings"], edge_type, axis=0)

    # entity_embeddings.data = F.normalize(entity_embeddings, p=2, dim=1)
    ent = jnp.pad(params["entity_embeddings"],
                  ((0, n_pad - num_nodes), (0, 0)))
    ent = l2_normalize(ent, tile_n)                                      # (n_pad, in)

    out_entity_1, out_relation_1 = spgat_forward(
        params["sparse_gat_1"], ent, params["relation_embeddings"],
        edge_list, edge_type, edge_embed, edge_list_nhop, edge_type_nhop,
        alpha, tile_n)

    len_pos = batch_inputs.shape[0] // 3
    tails = batch_inputs[:len_pos, 2]
    # torch.unique + mask[idx]=1.0  ==  scatter-set 1.0 at (possibly repeated) tails
    mask = jnp.zeros((n_pad,), jnp.float32).at[tails].set(1.0)

    # fused: entities_upgraded = ent @ W_entities ; + mask*out ; L2-normalize
    out_entity_1 = residual_combine_normalize(
        ent, params["W_entities"], mask[:, None], out_entity_1, tile_n)
    return out_entity_1[:num_nodes], out_relation_1


# --------------------------- deterministic init ------------------------------

def xavier_uniform(key, shape, gain=1.414):
    fan_in, fan_out = shape[0], shape[1]
    limit = gain * (6.0 / (fan_in + fan_out)) ** 0.5
    return jax.random.uniform(key, shape, jnp.float32, -limit, limit)


def build_params(key, num_nodes, entity_in_dim, relation_dim, num_relation,
                 entity_out_dim_1, nheads_1):
    keys = jax.random.split(key, 8 + 2 * nheads_1)
    ki = iter(range(len(keys)))
    heads = []
    for _ in range(nheads_1):
        heads.append({
            "a": xavier_uniform(keys[next(ki)],
                                (entity_out_dim_1,
                                 2 * entity_in_dim + relation_dim)),
            "a_2": xavier_uniform(keys[next(ki)], (1, entity_out_dim_1)),
        })
    hid = nheads_1 * entity_out_dim_1
    params = {
        "entity_embeddings": jax.random.normal(
            keys[next(ki)], (num_nodes, entity_in_dim), jnp.float32),
        "relation_embeddings": jax.random.normal(
            keys[next(ki)], (num_relation, relation_dim), jnp.float32),
        "W_entities": xavier_uniform(keys[next(ki)], (entity_in_dim, hid)),
        "sparse_gat_1": {
            "attentions": heads,
            "W": xavier_uniform(keys[next(ki)], (relation_dim, hid)),
            "out_att": {
                "a": xavier_uniform(keys[next(ki)], (hid, 3 * hid)),
                "a_2": xavier_uniform(keys[next(ki)], (1, hid)),
            },
        },
    }
    return params


# --------------------------- main --------------------------------------------

if __name__ == "__main__":
    key = jax.random.PRNGKey(0)

    num_nodes = 16
    entity_in_dim = 32
    relation_dim = 16
    num_relation = 4
    entity_out_dim = [8, 16]
    nheads_GAT = [2, 2]
    alpha = 0.2
    drop_GAT = 0.0  # dropout is identity for the deterministic run

    n_edges = 12
    n_nhop = 6
    n_batch = 6  # len_pos_triples = 2

    k_param, k_el, k_et, k_nh0, k_nh1, k_nh2, k_nh3, k_bi = jax.random.split(key, 8)
    params = build_params(k_param, num_nodes, entity_in_dim, relation_dim,
                          num_relation, entity_out_dim[0], nheads_GAT[0])

    edge_list = jax.random.randint(k_el, (2, n_edges), 0, num_nodes, jnp.int32)
    edge_type = jax.random.randint(k_et, (n_edges,), 0, num_relation, jnp.int32)
    train_indices_nhop = jnp.stack([
        jax.random.randint(k_nh0, (n_nhop,), 0, num_nodes, jnp.int32),
        jax.random.randint(k_nh1, (n_nhop,), 0, num_relation, jnp.int32),
        jax.random.randint(k_nh2, (n_nhop,), 0, num_relation, jnp.int32),
        jax.random.randint(k_nh3, (n_nhop,), 0, num_nodes, jnp.int32),
    ], axis=1)
    batch_inputs = jax.random.randint(k_bi, (n_batch, 3), 0, num_nodes, jnp.int32)

    out_entity, out_relation = spkbgat_forward(
        params, (edge_list, edge_type), batch_inputs, train_indices_nhop, alpha)
    out_entity = jax.block_until_ready(out_entity)
    out_relation = jax.block_until_ready(out_relation)

    assert out_entity.shape == (num_nodes, entity_out_dim[0] * nheads_GAT[0])
    assert out_relation.shape == (num_relation, entity_out_dim[0] * nheads_GAT[0])
    assert bool(jnp.all(jnp.isfinite(out_entity)))
    assert bool(jnp.all(jnp.isfinite(out_relation)))
    print("KERNEL_OK")
</pallas_src>

<mosaic_0001>
module attributes {stable_mosaic.version = 11 : i64} {
  func.func @_l2norm_kernel(%arg0: i32, %arg1: memref<16x32xf32, #tpu.memory_space<vmem>>, %arg2: memref<16x32xf32, #tpu.memory_space<vmem>>) attributes {dimension_semantics = [#tpu.dimension_semantics<parallel>], iteration_bounds = array<i64: 1>, scalar_prefetch = 0 : i64, scratch_operands = 0 : i64, tpu.core_type = #tpu.core_type<tc>, window_params = [{transform_indices = @transform_0, window_bounds = array<i64: 16, 32>}, {transform_indices = @transform_1, window_bounds = array<i64: 16, 32>}]} {
    %c0 = arith.constant 0 : index
    %c0_0 = arith.constant 0 : index
    %0 = vector.load %arg1[%c0, %c0_0] : memref<16x32xf32, #tpu.memory_space<vmem>>, vector<16x32xf32>
    %1 = arith.mulf %0, %0 : vector<16x32xf32>
    %cst = arith.constant dense<0.000000e+00> : vector<16xf32>
    %2 = vector.multi_reduction <add>, %1, %cst [1] : vector<16x32xf32> to vector<16xf32>
    %3 = vector.shape_cast %2 : vector<16xf32> to vector<16x1xf32>
    %cst_1 = arith.constant 1.000000e-24 : f32
    %4 = vector.broadcast %cst_1 : f32 to vector<16x1xf32>
    %5 = arith.maximumf %3, %4 : vector<16x1xf32>
    %6 = math.rsqrt %5 : vector<16x1xf32>
    %7 = vector.broadcast %6 : vector<16x1xf32> to vector<16x32xf32>
    %8 = arith.mulf %0, %7 : vector<16x32xf32>
    %c0_2 = arith.constant 0 : index
    %c0_3 = arith.constant 0 : index
    %9 = vector.load %arg2[%c0_2, %c0_3] : memref<16x32xf32, #tpu.memory_space<vmem>>, vector<16x32xf32>
    tpu.vector_store %arg2[%c0_2, %c0_3], %8 {strides = array<i32>} : memref<16x32xf32, #tpu.memory_space<vmem>>, vector<16x32xf32>,
    return
  }
  func.func @transform_0(%arg0: i32) -> (i32, i32) {
    %c0_i32 = arith.constant 0 : i32
    %c0_i32_0 = arith.constant 0 : i32
    return %arg0, %c0_i32 : i32, i32
  }
  func.func @transform_1(%arg0: i32) -> (i32, i32) {
    %c0_i32 = arith.constant 0 : i32
    %c0_i32_0 = arith.constant 0 : i32
    return %arg0, %c0_i32 : i32, i32
  }
}

</mosaic_0001>

<bundles_post_ra>
// kernel: tpu_custom_call.1
= control target key start
LH: loop header
LB: loop body
LE: loop exit
PB: predicated region body
PF: predicated region fallthrough
CT: control target
= control target key end

     0   :  { %6 = vsyncpa [#allocation3], 0  ;;  %s163_s0 = inlined_call_operand.hbm [shape: f32[16,32], index: 0, kind: input, shape index: {}]   ;;  %s164_s1 = inlined_call_operand.hbm [shape: f32[16,32], index: 1, kind: output, shape index: {}]  }
   0x1   :  { %7 = vsyncpa [#allocation4], 0  ;;  %s115_s6 = smov [#allocation2]   ;;  %s67_s10 = scalar_lea.hbm %s163_s0, 256 }
   0x2   :  { %s13_s7 = sshll.u32 %s115_s6, 4  ;;  %p68_p0 = scmp.ne.s32.totalorder %s163_s0, %s67_s10  ;;  %s14_s7 = int_to_ptr.vmem [resolvable:$true] %s13_s7 }
   0x3   :  { %p71_p1 = scmp.lt.u32.totalorder %s67_s10, %s163_s0 }
   0x5   :  { %p73_p2 = pnand %p71_p1, %p68_p0 }
   0x7   :  { %76 = shalt.err (!%p73_p2)
}
   0x8   :  { %s77_s15 = scalar_lea.vmem %s14_s7, 256  ;;  %p82_p4 = scmp.lt.s32.totalorder %s14_s7, %s14_s7 }
   0x9   :  { %p78_p3 = scmp.ne.s32.totalorder %s14_s7, %s77_s15  ;;  %p83_p5 = scmp.lt.s32.totalorder %s77_s15, %s77_s15 }
   0xb   :  { %p84_p6 = por %p83_p5, %p82_p4 }
   0xd   :  { %p85_p7 = pnand %p84_p6, %p78_p3 }
   0xf   :  { %88 = shalt.err (!%p85_p7)
}
  0x10   :  { %s116_s16 = smov 128   ;;  %s117_s17 = smov 8  }
  0x11   :  { %19 = dma.hbm_to_vmem [thread:$0]  %s163_s0, 256, %s14_s7, [#allocation3], %s116_s16, %s116_s16, %s117_s17  }
  0x12   :  { %111 = dma.done.wait [#allocation3], 256  }
  0x13   :  { %112 = vsyncadd [#allocation3], 4294967040  ;;  %v23_v0 = vld [vmem:[#allocation2] sm:$0xff]  ;;  %vm27_vm0 = vcmask 261120   ;;  %v24_v1 = vld [vmem:[#allocation2 + $0x8] sm:$0xff]  ;;  %s118_s0 = smov [#allocation5]  }
  0x14   :  { %v25_v2 = vmul.f32 %v23_v0, %v23_v0  ;;  %v26_v3 = vmul.f32 %v24_v1, %v24_v1  ;;  %s47_s20 = sshll.u32 %s118_s0, 4  ;;  %s48_s20 = int_to_ptr.vmem [resolvable:$true] %s47_s20 }
  0x15   :  { %s89_s21 = scalar_lea.vmem %s48_s20, 256  ;;  %p94_p9 = scmp.lt.s32.totalorder %s48_s20, %s48_s20 }
  0x16   :  { %v28_v4 = vsel %vm27_vm0, %v25_v2, 0.0  ;;  %v31_v5 = vsel %vm27_vm0, %v26_v3, 0.0  ;;  %p90_p8 = scmp.ne.s32.totalorder %s48_s20, %s89_s21  ;;  %p95_p10 = scmp.lt.s32.totalorder %s89_s21, %s89_s21 }
  0x17   :  { %29 = vadd.xlane.f32.xlu0 %v28_v4 }
  0x18   :  { %p96_p11 = por %p95_p10, %p94_p9 }
  0x1a   :  { %p97_p12 = pnand %p96_p11, %p90_p8 }
  0x1b   :  { %32 = vadd.xlane.f32.xlu0 %v31_v5 }
  0xa4   :  { %v30_v6 = vpop.xlane.xlu0 %29 }
  0xa5   :  { %v34_v7 = vmax.f32 %v30_v6, 1e-24 }
  0xa7   :  { %63 = vrsqrt.f32 %v34_v7 }
  0xa8   :  { %v33_v8 = vpop.xlane.xlu0 %32 }
  0xa9   :  { %v35_v9 = vmax.f32 %v33_v8, 1e-24 }
  0xab   :  { %65 = vrsqrt.f32 %v35_v9 }
  0xb1   :  { %v64_v10 = vpop.eup %63 }
  0xb2   :  { %v38_v11 = vmul.f32 %v64_v10, %v23_v0 }
  0xb4   :  { %40 = vst.msk [vmem:[#allocation5] sm:$0xff] %vm27_vm0, %v38_v11 }
  0xb5   :  { %v66_v12 = vpop.eup %65 }
  0xb6   :  { %v39_v13 = vmul.f32 %v66_v12, %v24_v1 }
  0xb8   :  { %41 = vst.msk [vmem:[#allocation5 + $0x8] sm:$0xff] %vm27_vm0, %v39_v13 }
  0xb9   :  { %100 = shalt.err (!%p97_p12)
}
  0xba   :  { %s101_s24 = scalar_lea.hbm %s164_s1, 256 }
  0xbb   :  { %p102_p13 = scmp.ne.s32.totalorder %s164_s1, %s101_s24  ;;  %p105_p0 = scmp.lt.u32.totalorder %s101_s24, %s164_s1 }
  0xbd   :  { %p107_p1 = pnand %p105_p0, %p102_p13 }
  0xbf   :  { %110 = shalt.err (!%p107_p1)
}
  0xc0   :  { %53 = dma.vmem_to_hbm [thread:$0]  %s48_s20, 256, %s164_s1, [#allocation4], %s116_s16, %s116_s16, %s117_s17  }
  0xc1   :  { %113 = dma.done.wait [#allocation4], 256  }
  0xc2   :  { %114 = vsyncadd [#allocation4], 4294967040 }
  0xc3   :  { %57 = vsyncpa [#allocation3], 1 }
  0xc4   :  { %58 = vsyncpa [#allocation4], 1 }

</bundles_post_ra>
